<compile_context>
chip_gen: v6e
topology: v6e:2x2x1
jax: 0.10.0
libtpu: 0.0.40
codegen_flags: <defaults>
</compile_context>

<pallas_src>
from functools import partial

import jax
import jax.numpy as jnp
from jax import lax
from jax.experimental import pallas as pl
from jax.experimental.pallas import tpu as pltpu


LANES = 128

# Tensors smaller than this bypass Pallas and run as one fused XLA elementwise
# pass (kernel-launch/grid overhead is not worth it).  Production would use
# ~64K elements; kept small here so the demo's small shapes still exercise the
# Pallas kernels.
_PALLAS_MIN_ELEMS = 512


def _sublane_multiple(dtype):
    """Row-tiling multiple for the dtype (f32: 8, bf16/f16: 16, 8-bit: 32)."""
    itemsize = jnp.dtype(dtype).itemsize
    if itemsize >= 4:
        return 8
    if itemsize == 2:
        return 16
    return 32


def _choose_cols(n):
    """Widest lane-dense last dim: 128*d with d | (n // 128), capped at 4096."""
    if n % LANES != 0:
        return None
    m = n // LANES
    for d in range(min(32, m), 0, -1):
        if m % d == 0:
            return LANES * d
    return LANES


# --------------------------------------------------------------------------- #
# Fused fake-quant Pallas kernels (scalars live in SMEM, data tiles in VMEM).  #
# --------------------------------------------------------------------------- #
def _nonsym_fake_quant_kernel(s_ref, x_ref, o_ref):
    # Nonsymmetric (activations):
    #   clamp = (clip(x, lower, upper) - lower) / scale
    #   out   = scale * round(clamp) + lower
    lower = s_ref[0]
    upper = s_ref[1]
    scale = s_ref[2]
    clamp = (jnp.clip(x_ref[...], lower, upper) - lower) / scale
    o_ref[...] = scale * jnp.round(clamp) + lower


def _sym_fake_quant_kernel(s_ref, x_ref, o_ref):
    # Symmetric (weights):
    #   out = round(clip(x * scale, val_min, val_max)) * (1 / scale)
    scale = s_ref[0]
    inv_scale = s_ref[1]
    val_min = s_ref[2]
    val_max = s_ref[3]
    clamp = jnp.clip(x_ref[...] * scale, val_min, val_max)
    o_ref[...] = jnp.round(clamp) * inv_scale


def _fused_elementwise_pallas(kernel, x, scalars):
    """Run `kernel` over x reshaped to a lane-dense 2-D slab (free reshape)."""
    n = x.size
    dtype = x.dtype
    itemsize = jnp.dtype(dtype).itemsize
    cols = _choose_cols(n)
    rows = n // cols
    x2d = x.reshape(rows, cols)

    sub = _sublane_multiple(dtype)
    # ~2 MiB blocks: amortize the ~0.35 us per-grid-step overhead while the
    # double-buffered input + output (~8 MiB) stays under the default scoped
    # VMEM limit on v5e (16 MiB) as well as v6e/v7x (32 MiB).
    target_block_bytes = 2 * 1024 * 1024
    tile_rows = max(sub, (target_block_bytes // (cols * itemsize)) // sub * sub)
    if rows >= 2 * sub:
        # Keep >= 2 grid steps so dimension_semantics=("parallel",) can shard
        # the grid across v7x's two TensorCores (no-op on single-TC v5e/v6e).
        half_rows = max(sub, (pl.cdiv(rows, 2) // sub) * sub)
        tile_rows = min(tile_rows, half_rows)
    tile_rows = min(tile_rows, rows)

    grid = (pl.cdiv(rows, tile_rows),)
    out2d = pl.pallas_call(
        kernel,
        out_shape=jax.ShapeDtypeStruct((rows, cols), dtype),
        grid=grid,
        in_specs=[
            pl.BlockSpec(memory_space=pltpu.MemorySpace.SMEM),   # scalar params
            pl.BlockSpec((tile_rows, cols), lambda i: (i, 0)),   # data tile
        ],
        out_specs=pl.BlockSpec((tile_rows, cols), lambda i: (i, 0)),
        compiler_params=pltpu.CompilerParams(
            dimension_semantics=("parallel",)),
        cost_estimate=pl.CostEstimate(
            flops=6 * n, transcendentals=0, bytes_accessed=2 * n * itemsize),
    )(scalars, x2d)
    return out2d.reshape(x.shape)


def _use_fused_pallas(x, *params):
    # Fused Pallas path needs per-tensor (size-1) quantization parameters and a
    # lane-dense (128-divisible) element count that is worth a kernel launch.
    # TODO(synk): large non-128-divisible tensors also take the XLA path; an
    # in-kernel masked tail (pltpu.store with mask) would keep them on Pallas.
    return (x.size >= _PALLAS_MIN_ELEMS
            and x.size % LANES == 0
            and all(int(p.size) == 1 for p in params))


# --------------------------------------------------------------------------- #
# Nonsymmetric fake-quant (activations): fused forward, exact STE backward.    #
# --------------------------------------------------------------------------- #
def _nonsym_ref_ste(x, lower, length, bits):
    """Pure-JAX reference with STE on round; its autodiff defines the backward."""
    qmax = 2.0 ** bits - 1.0
    length_abs = jnp.abs(length)
    upper = lower + length_abs
    scale = length_abs / qmax
    clamp = (jnp.clip(x, lower, upper) - lower) / scale
    quant = clamp + lax.stop_gradient(jnp.round(clamp) - clamp)   # STE
    return scale * quant + lower


def _nonsym_impl(x, lower, length, bits):
    qmax = 2.0 ** bits - 1.0
    length_abs = jnp.abs(length)
    upper = lower + length_abs
    scale = length_abs / qmax
    if _use_fused_pallas(x, lower, length):
        scalars = jnp.concatenate(
            [lower.reshape(-1), upper.reshape(-1), scale.reshape(-1)]
        ).astype(x.dtype)
        return _fused_elementwise_pallas(_nonsym_fake_quant_kernel, x, scalars)
    # Small / ragged / per-channel fallback: one fused XLA elementwise pass.
    clamp = (jnp.clip(x, lower, upper) - lower) / scale
    return scale * jnp.round(clamp) + lower


@partial(jax.custom_vjp, nondiff_argnums=(3,))
def nonsym_fake_quant(x, lower, length, bits):
    return _nonsym_impl(x, lower, length, bits)


def _nonsym_fwd(x, lower, length, bits):
    return _nonsym_impl(x, lower, length, bits), (x, lower, length)


def _nonsym_bwd(bits, res, g):
    x, lower, length = res
    _, vjp = jax.vjp(
        lambda xx, lo, le: _nonsym_ref_ste(xx, lo, le, bits), x, lower, length)
    return vjp(g)


nonsym_fake_quant.defvjp(_nonsym_fwd, _nonsym_bwd)


# --------------------------------------------------------------------------- #
# Symmetric fake-quant (weights): fused forward, exact STE backward.           #
# --------------------------------------------------------------------------- #
def _sym_ref_ste(x, scale_param, bits):
    val_max = float(2 ** (bits - 1) - 1)
    val_min = float(-(2 ** (bits - 1)))
    scale = val_max / scale_param
    clamp = jnp.clip(x * scale, val_min, val_max)
    quant = clamp + lax.stop_gradient(jnp.round(clamp) - clamp)   # STE
    return quant * (1.0 / scale)


def _sym_impl(x, scale_param, bits):
    val_max = float(2 ** (bits - 1) - 1)
    val_min = float(-(2 ** (bits - 1)))
    scale = val_max / scale_param
    inv_scale = 1.0 / scale
    if _use_fused_pallas(x, scale_param):
        scalars = jnp.concatenate([
            scale.reshape(-1),
            inv_scale.reshape(-1),
            jnp.full((1,), val_min, scale.dtype),
            jnp.full((1,), val_max, scale.dtype),
        ]).astype(x.dtype)
        return _fused_elementwise_pallas(_sym_fake_quant_kernel, x, scalars)
    clamp = jnp.clip(x * scale, val_min, val_max)
    return jnp.round(clamp) * inv_scale


@partial(jax.custom_vjp, nondiff_argnums=(2,))
def sym_fake_quant(x, scale_param, bits):
    return _sym_impl(x, scale_param, bits)


def _sym_fwd(x, scale_param, bits):
    return _sym_impl(x, scale_param, bits), (x, scale_param)


def _sym_bwd(bits, res, g):
    x, scale_param = res
    _, vjp = jax.vjp(lambda xx, sp: _sym_ref_ste(xx, sp, bits), x, scale_param)
    return vjp(g)


sym_fake_quant.defvjp(_sym_fwd, _sym_bwd)


# --------------------------------------------------------------------------- #
# Module-level classes mirroring the PyTorch API.                              #
# --------------------------------------------------------------------------- #
@partial(jax.custom_vjp, nondiff_argnums=(1,))
def _ste_apply(x, op):
    return op(x)


def _ste_apply_fwd(x, op):
    return op(x), None


def _ste_apply_bwd(op, _, g):
    return (g,)


_ste_apply.defvjp(_ste_apply_fwd, _ste_apply_bwd)


class StraightThroughEstimator:
    """Forward = op(x), backward = identity (straight-through).

    Kept for API parity with the PyTorch module; in the fused fake-quant path
    the round() runs inside the Pallas kernels instead of here.
    TODO(synk): arbitrary elementwise `op` callables run as plain JAX; only
    round (the op both quantizers use) is fused into Pallas.
    """

    def __init__(self, op=jnp.round):
        self.op = op

    def __call__(self, x):
        return _ste_apply(x, self.op)


class NonsymmetricQuantizerU:
    """Nonsymmetric fake-quantization to unsigned int (activations)."""

    def __init__(self, shape=(1,), bits=8, dtype=jnp.float32):
        self.lower = jnp.zeros(shape, dtype)
        self.length = jnp.ones(shape, dtype)
        self.bits = bits
        self.round_ste = StraightThroughEstimator(op=jnp.round)  # API parity

    def __call__(self, x):
        # clamp / shift / scale / round(STE) / dequant fused into one Pallas pass.
        return nonsym_fake_quant(x, self.lower, self.length, self.bits)


class SymmetricQuantizer:
    """Zero-centered symmetric fake-quantization (weights)."""

    def __init__(self, shape=(1,), bits=8, dtype=jnp.float32):
        self.scale = jnp.ones(shape, dtype)
        self.bits = bits
        self.val_min = -(2 ** (bits - 1))
        self.val_max = 2 ** (bits - 1) - 1
        self.round_ste = StraightThroughEstimator(op=jnp.round)  # API parity

    def __call__(self, x):
        return sym_fake_quant(x, self.scale, self.bits)


class QModule:
    """Base class for quantized modules (activation + weight fake-quant)."""

    def __init__(self, weight, bias=None, bits=8,
                 activation_shape=(1,), weight_shape=(1,)):
        self.weight = weight
        self.bias = bias
        self.activation_quantizer = NonsymmetricQuantizerU(
            shape=activation_shape, bits=bits)
        self.weight_quantizer = SymmetricQuantizer(shape=weight_shape, bits=bits)

    def __call__(self, x):
        x_q = self.activation_quantizer(x)
        w_q = self.weight_quantizer(self.weight)
        return self._forward(x_q, w_q, self.bias)

    def _forward(self, x, w, b):
        # TODO(synk): NotImplemented in the PyTorch base class; concrete
        # subclasses (QLinear/QConv) should keep values as int8 and drive the
        # MXU with int8 x int8 matmul + fused dequant on v5e/v6e, but use fp8
        # or bf16 on v7x (its MXU has no integer datapath).
        raise NotImplementedError


if __name__ == "__main__":
    key = jax.random.PRNGKey(0)
    kx, kw, kc = jax.random.split(key, 3)

    bits = 8
    # QLinear-flavoured shapes: batch=2, seq=8, hidden=32.
    x = jax.random.normal(kx, (2, 8, 32), dtype=jnp.float32) * 3.0   # 512  -> Pallas path
    w = jax.random.normal(kw, (32, 32), dtype=jnp.float32)           # 1024 -> Pallas path
    w_conv = jax.random.normal(kc, (8, 4, 3, 3), dtype=jnp.float32)  # 288  -> XLA bypass

    qmod = QModule(weight=w, bias=jnp.zeros((32,), jnp.float32), bits=bits)
    aq = qmod.activation_quantizer
    wq = qmod.weight_quantizer

    # QModule.forward = activation fake-quant -> weight fake-quant -> _forward;
    # _forward is NotImplemented in the base class, so exercise the quantizers
    # (which hold all the real compute, incl. the fused Pallas kernels).
    x_q = aq(x)
    w_q = wq(w)
    w_conv_q = wq(w_conv)
    x_q, w_q, w_conv_q = jax.block_until_ready((x_q, w_q, w_conv_q))

    # --- forward correctness vs. plain-JAX references (torch math) -----------
    length = jnp.abs(aq.length)
    upper = aq.lower + length
    a_scale = length / (2 ** bits - 1)
    x_ref = a_scale * jnp.round(
        (jnp.clip(x, aq.lower, upper) - aq.lower) / a_scale) + aq.lower

    w_scale = wq.val_max / wq.scale

    def sym_ref(t):
        return jnp.round(jnp.clip(t * w_scale, wq.val_min, wq.val_max)) * (1.0 / w_scale)

    assert x_q.shape == x.shape and x_q.dtype == x.dtype
    assert jnp.allclose(x_q, x_ref, atol=1e-6), "activation fake-quant mismatch"
    assert jnp.allclose(w_q, sym_ref(w), atol=1e-6), "weight fake-quant mismatch (Pallas)"
    assert jnp.allclose(w_conv_q, sym_ref(w_conv), atol=1e-6), "weight fake-quant mismatch (bypass)"

    # --- backward: STE + clip masks must match autodiff of the reference -----
    g_x = jax.grad(lambda t: jnp.sum(aq(t)))(x)
    g_x_ref = jax.grad(
        lambda t: jnp.sum(_nonsym_ref_ste(t, aq.lower, aq.length, bits)))(x)
    g_w = jax.grad(lambda t: jnp.sum(wq(t)))(w)
    g_w_ref = jax.grad(lambda t: jnp.sum(_sym_ref_ste(t, wq.scale, bits)))(w)
    g_x, g_x_ref, g_w, g_w_ref = jax.block_until_ready((g_x, g_x_ref, g_w, g_w_ref))
    assert jnp.allclose(g_x, g_x_ref, atol=1e-6), "nonsymmetric backward mismatch"
    assert jnp.allclose(g_w, g_w_ref, atol=1e-6), "symmetric backward mismatch"

    # --- standalone straight-through estimator: identity gradient ------------
    g_s = jax.grad(lambda t: jnp.sum(StraightThroughEstimator(jnp.round)(t)))(x)
    assert jnp.allclose(g_s, jnp.ones_like(x)), "STE backward mismatch"

    print("KERNEL_OK")
</pallas_src>

<mosaic_0001>
module attributes {stable_mosaic.version = 11 : i64} {
  func.func @_nonsym_fake_quant_kernel(%arg0: i32, %arg1: memref<3xf32, #tpu.memory_space<smem>>, %arg2: memref<1x512xf32, #tpu.memory_space<vmem>>, %arg3: memref<1x512xf32, #tpu.memory_space<vmem>>) attributes {dimension_semantics = [#tpu.dimension_semantics<parallel>], iteration_bounds = array<i64: 1>, scalar_prefetch = 0 : i64, scratch_operands = 0 : i64, tpu.core_type = #tpu.core_type<tc>, window_params = [{transform_indices = @transform_0, window_bounds = array<i64: 3>}, {transform_indices = @transform_1, window_bounds = array<i64: 1, 512>}, {transform_indices = @transform_2, window_bounds = array<i64: 1, 512>}]} {
    %c0 = arith.constant 0 : index
    %0 = memref.load %arg1[%c0] : memref<3xf32, #tpu.memory_space<smem>>
    %c1 = arith.constant 1 : index
    %1 = memref.load %arg1[%c1] : memref<3xf32, #tpu.memory_space<smem>>
    %c2 = arith.constant 2 : index
    %2 = memref.load %arg1[%c2] : memref<3xf32, #tpu.memory_space<smem>>
    %c0_0 = arith.constant 0 : index
    %c0_1 = arith.constant 0 : index
    %3 = vector.load %arg2[%c0_0, %c0_1] : memref<1x512xf32, #tpu.memory_space<vmem>>, vector<1x512xf32>
    %4 = vector.broadcast %0 : f32 to vector<1x512xf32>
    %5 = arith.maximumf %4, %3 : vector<1x512xf32>
    %6 = vector.broadcast %1 : f32 to vector<1x512xf32>
    %7 = arith.minimumf %6, %5 : vector<1x512xf32>
    %8 = vector.broadcast %0 : f32 to vector<1x512xf32>
    %9 = arith.subf %7, %8 : vector<1x512xf32>
    %10 = vector.broadcast %2 : f32 to vector<1x512xf32>
    %11 = arith.divf %9, %10 : vector<1x512xf32>
    %12 = math.roundeven %11 : vector<1x512xf32>
    %13 = vector.broadcast %2 : f32 to vector<1x512xf32>
    %14 = arith.mulf %13, %12 : vector<1x512xf32>
    %15 = vector.broadcast %0 : f32 to vector<1x512xf32>
    %16 = arith.addf %14, %15 : vector<1x512xf32>
    %c0_2 = arith.constant 0 : index
    %c0_3 = arith.constant 0 : index
    %17 = vector.load %arg3[%c0_2, %c0_3] : memref<1x512xf32, #tpu.memory_space<vmem>>, vector<1x512xf32>
    tpu.vector_store %arg3[%c0_2, %c0_3], %16 {strides = array<i32>} : memref<1x512xf32, #tpu.memory_space<vmem>>, vector<1x512xf32>,
    return
  }
  func.func @transform_0(%arg0: i32) -> i32 {
    %c0_i32 = arith.constant 0 : i32
    %c0_i32_0 = arith.constant 0 : i32
    return %c0_i32 : i32
  }
  func.func @transform_1(%arg0: i32) -> (i32, i32) {
    %c0_i32 = arith.constant 0 : i32
    %c0_i32_0 = arith.constant 0 : i32
    return %arg0, %c0_i32 : i32, i32
  }
  func.func @transform_2(%arg0: i32) -> (i32, i32) {
    %c0_i32 = arith.constant 0 : i32
    %c0_i32_0 = arith.constant 0 : i32
    return %arg0, %c0_i32 : i32, i32
  }
}

</mosaic_0001>

<bundles_post_ra>
// kernel: tpu_custom_call.1
= control target key start
LH: loop header
LB: loop body
LE: loop exit
PB: predicated region body
PF: predicated region fallthrough
CT: control target
= control target key end

     0   :  { %7 = vsyncpa [#allocation5], 0  ;;  %s167_s0 = inlined_call_operand.hbm [shape: f32[3], index: 0, kind: input, shape index: {}]   ;;  %s168_s1 = inlined_call_operand.hbm [shape: f32[1,512], index: 1, kind: input, shape index: {}]   ;;  %s169_s2 = inlined_call_operand.hbm [shape: f32[1,512], index: 2, kind: output, shape index: {}]  }
   0x1   :  { %8 = vsyncpa [#allocation3], 0 }
   0x2   :  { %9 = vsyncpa [#allocation4], 0  ;;  %s140_s9 = smov [#allocation2]   ;;  %s141_s12 = smov [#allocation6]  }
   0x3   :  { %17 = dma.hbm_to_smem %s167_s0, 16, %s140_s9, [#allocation5]  }
   0x4   :  { %s24_s13 = sshll.u32 %s141_s12, 4  ;;  %s25_s13 = int_to_ptr.vmem [resolvable:$true] %s24_s13 }
   0x5   :  { %s102_s14 = scalar_lea.vmem %s25_s13, 64  ;;  %p107_p1 = scmp.lt.s32.totalorder %s25_s13, %s25_s13 }
   0x6   :  { %p103_p0 = scmp.ne.s32.totalorder %s25_s13, %s102_s14  ;;  %p108_p2 = scmp.lt.s32.totalorder %s102_s14, %s102_s14 }
   0x8   :  { %p109_p3 = por %p108_p2, %p107_p1 }
   0xa   :  { %p110_p4 = pnand %p109_p3, %p103_p0 }
   0xc   :  { %113 = shalt.err (!%p110_p4)
}
   0xd   :  { %27 = dma.hbm_to_vmem [thread:$0]  %s168_s1, 64, %s25_s13, [#allocation3]  }
   0xe   :  { %134 = dma.done.wait [#allocation5], 16  }
   0xf   :  { %135 = vsyncadd [#allocation5], 4294967280 }
  0x10   :  { %136 = dma.done.wait [#allocation3], 64  }
  0x11   :  { %137 = vsyncadd [#allocation3], 4294967232 }
  0x12   :  { %34 = sfence }
  0x13   :  { %s35_s0 = sld [smem:[#allocation2]]  ;;  %v38_v0 = vld [vmem:[#allocation6] sm:$0xf]  ;;  %v50_v15 = vlaneseq  ;;  %s142_s1 = smov [#allocation7]  }
  0x14   :  { %s72_s17 = sld [smem:[#allocation2 + $0x2]]  ;;  %s61_s19 = sshll.u32 %s142_s1, 4  ;;  %s62_s19 = int_to_ptr.vmem [resolvable:$true] %s61_s19 }
  0x15   :  { %s71_s18 = sld [smem:[#allocation2 + $0x1]]  ;;  %vm52_vm1 = vcmp.lt.s32.totalorder %v50_v15, 512  ;;  %s114_s20 = scalar_lea.vmem %s62_s19, 64 }
  0x16   :  { %p115_p5 = scmp.ne.s32.totalorder %s62_s19, %s114_s20  ;;  %p119_p6 = scmp.lt.s32.totalorder %s62_s19, %s62_s19 }
  0x17   :  { %p120_p7 = scmp.lt.s32.totalorder %s114_s20, %s114_s20 }
  0x19   :  { %v39_v1 = vstv %s35_s0  ;;  %p121_p8 = por %p120_p7, %p119_p6 }
  0x1a   :  { %v44_v2 = vstv %s72_s17  ;;  %v40_v3 = vmax.f32 %v39_v1, %v38_v0 }
  0x1b   :  { %84 = vrcp.f32 %v44_v2  ;;  %v41_v4 = vstv %s71_s18  ;;  %p122_p9 = pnand %p121_p8, %p115_p5 }
  0x1c   :  { %v42_v5 = vmin.f32 %v41_v4, %v40_v3 }
  0x1e   :  { %v43_v6 = vsub.f32 %v42_v5, %v39_v1 }
  0x28   :  { %v85_v7 = vpop.eup %84 }
  0x29   :  { %v46_v8 = vmul.f32 %v85_v7, %v43_v6 }
  0x2b   :  { %v75_v9 = vcvt.f32.s32 %v46_v8  ;;  %v73_v10 = vand.u32 2147483647, %v46_v8  ;;  %v78_v12 = vand.u32 2147483648, %v46_v8 }
  0x2d   :  { %v76_v11 = vcvt.s32.f32 %v75_v9  ;;  %vm74_vm0 = vcmp.lt.f32.partialorder %v73_v10, 8388608.0 }
  0x2f   :  { %v77_v13 = vand.u32 2147483647, %v76_v11 }
  0x31   :  { %v79_v14 = vor.u32 %v78_v12, %v77_v13 }
  0x33   :  { %v80_v16 = vsel %vm74_vm0, %v79_v14, %v46_v8 }
  0x34   :  { %v48_v17 = vmul.f32 %v80_v16, %v44_v2 }
  0x36   :  { %v49_v18 = vadd.f32 %v48_v17, %v39_v1 }
  0x38   :  { %54 = vst.msk [vmem:[#allocation7] sm:$0xf] %vm52_vm1, %v49_v18 }
  0x39   :  { %125 = shalt.err (!%p122_p9)
}
  0x3a   :  { %64 = dma.vmem_to_hbm [thread:$0]  %s62_s19, 64, %s169_s2, [#allocation4]  }
  0x3b   :  { %138 = dma.done.wait [#allocation4], 64  }
  0x3c   :  { %139 = vsyncadd [#allocation4], 4294967232 }
  0x3d   :  { %68 = vsyncpa [#allocation3], 1 }
  0x3e   :  { %69 = vsyncpa [#allocation4], 1 }
  0x3f   :  { %70 = vsyncpa [#allocation5], 1 }

</bundles_post_ra>
